<compile_context>
chip_gen: v7x
topology: tpu7x:2x2x1
jax: 0.10.0
libtpu: 0.0.40
codegen_flags: <defaults>
</compile_context>

<pallas_src>
import math
import functools

import jax
import jax.numpy as jnp
from jax import lax
from jax.experimental import pallas as pl
from jax.experimental.pallas import tpu as pltpu


# --------------------------------------------------------------------------- #
# global knobs
# --------------------------------------------------------------------------- #
# Set to jnp.bfloat16 on v5e/v6e/v7x production runs for the native bf16 MXU path
# (halves MXU cycles; accumulation stays f32). Kept f32 here so the numerical check
# against the f32 reference stays tight.
MXU_DTYPE = jnp.float32

ROW_TILE_TARGET = 1024      # large row tiles amortize the ~0.35us/grid-step overhead


def _mxu(x):
    return x.astype(MXU_DTYPE)


def _round_up(x: int, m: int) -> int:
    return (x + m - 1) // m * m


def _pick_row_tile(rows: int, target: int = ROW_TILE_TARGET) -> int:
    """rows is a multiple of 8. Largest multiple-of-8 divisor of rows that is <= target
    and (when possible) leaves >= 2 grid steps, so both TensorCores on a v7x megacore
    get work and no per-call padding/slicing copies are needed."""
    best = None
    d = 8
    while d <= min(target, rows):
        if rows % d == 0 and rows // d >= 2:
            best = d
        d += 8
    return best if best is not None else rows


def _compiler_params():
    # 48 MiB scoped VMEM: above the 32 MiB default (v5e/v6e have 128 MiB physical),
    # still safe inside v7x's 64 MiB physical VMEM.
    return pltpu.CompilerParams(
        dimension_semantics=("parallel",),
        vmem_limit_bytes=48 * 1024 * 1024,
    )


# --------------------------------------------------------------------------- #
# embedding tables (non-trainable, identical to the PyTorch constructors)
# --------------------------------------------------------------------------- #
def fixed_embedding_table(c_in: int, d_model: int) -> jnp.ndarray:
    """FixedEmbedding.__init__ table."""
    position = jnp.arange(c_in, dtype=jnp.float32)[:, None]
    div_term = jnp.exp(
        jnp.arange(0, d_model, 2, dtype=jnp.float32) * (-(math.log(10000.0) / d_model))
    )
    w = jnp.zeros((c_in, d_model), dtype=jnp.float32)
    w = w.at[:, 0::2].set(jnp.sin(position * div_term))
    w = w.at[:, 1::2].set(jnp.cos(position * div_term))
    return w


def positional_table(d_model: int, max_len: int = 500) -> jnp.ndarray:
    """PositionalEmbedding.__init__ table (row 0 is the zero pad row)."""
    j = jnp.arange(d_model)
    denom = jnp.power(10000.0, 2.0 * (j // 2).astype(jnp.float32) / d_model)
    pos = jnp.arange(max_len, dtype=jnp.float32)[:, None]
    pe = pos / denom[None, :]
    pe = pe.at[:, 0::2].set(jnp.sin(pe[:, 0::2]))
    pe = pe.at[:, 1::2].set(jnp.cos(pe[:, 1::2]))
    return jnp.concatenate([jnp.zeros((1, d_model), jnp.float32), pe], axis=0)


# --------------------------------------------------------------------------- #
# Pallas kernel 1: fused DataEmbedding
#   out = xs @ W_tok + multihot(idx) @ merged_table   (token + temporal + positional)
# --------------------------------------------------------------------------- #
def _embed_kernel(xs_ref, idx_ref, tokw_ref, tab_ref, o_ref):
    tok = jnp.dot(_mxu(xs_ref[...]), _mxu(tokw_ref[...]),
                  preferred_element_type=jnp.float32)
    idx = idx_ref[...]                                     # (tile_m, F) int32, pre-offset
    tn, nf = idx.shape
    kp = tab_ref.shape[0]
    # one broadcast compare summed over the field axis (no per-field python loop)
    iota = lax.broadcasted_iota(jnp.int32, (tn, nf, kp), 2)
    mh = jnp.sum((idx[:, :, None] == iota).astype(jnp.float32), axis=1)   # (tile_m, Kp)
    o_ref[...] = tok + jnp.dot(_mxu(mh), _mxu(tab_ref[...]),
                               preferred_element_type=jnp.float32)


def pallas_embedding(xs, idx, tok_w, table, tile_m):
    M, Kc = xs.shape
    F = idx.shape[1]
    Kp, D = table.shape
    cost = pl.CostEstimate(
        flops=2 * M * Kc * D + 2 * M * Kp * D + M * F * Kp,
        transcendentals=0,
        bytes_accessed=4 * (M * Kc + M * F + Kc * D + Kp * D + M * D),
    )
    return pl.pallas_call(
        _embed_kernel,
        out_shape=jax.ShapeDtypeStruct((M, D), jnp.float32),
        grid=(M // tile_m,),
        in_specs=[
            pl.BlockSpec((tile_m, Kc), lambda i: (i, 0)),
            pl.BlockSpec((tile_m, F), lambda i: (i, 0)),
            pl.BlockSpec((Kc, D), lambda i: (0, 0)),       # token conv weight resident
            pl.BlockSpec((Kp, D), lambda i: (0, 0)),       # merged table resident
        ],
        out_specs=pl.BlockSpec((tile_m, D), lambda i: (i, 0)),
        compiler_params=_compiler_params(),
        cost_estimate=cost,
    )(xs, idx, tok_w, table)


# --------------------------------------------------------------------------- #
# Pallas kernel 2: linear (fused QKV projection: x @ [Wq|Wk|Wv] + b)
# --------------------------------------------------------------------------- #
def _linear_kernel(x_ref, w_ref, b_ref, o_ref):
    o_ref[...] = jnp.dot(_mxu(x_ref[...]), _mxu(w_ref[...]),
                         preferred_element_type=jnp.float32) + b_ref[...]


def pallas_linear(x, w, b, tile_m):
    M, K = x.shape
    N = w.shape[1]
    cost = pl.CostEstimate(flops=2 * M * K * N, transcendentals=0,
                           bytes_accessed=4 * (M * K + K * N + M * N + N))
    return pl.pallas_call(
        _linear_kernel,
        out_shape=jax.ShapeDtypeStruct((M, N), jnp.float32),
        grid=(M // tile_m,),
        in_specs=[
            pl.BlockSpec((tile_m, K), lambda i: (i, 0)),
            pl.BlockSpec((K, N), lambda i: (0, 0)),
            pl.BlockSpec((1, N), lambda i: (0, 0)),
        ],
        out_specs=pl.BlockSpec((tile_m, N), lambda i: (i, 0)),
        compiler_params=_compiler_params(),
        cost_estimate=cost,
    )(x, w, b.reshape(1, N))


# --------------------------------------------------------------------------- #
# Pallas kernel 3: causal full attention
#   grid=(B,): all H heads of one batch per step; heads are static lane slices of the
#   fused QKV block (no HBM transposes); q scaled once; approx reciprocal softmax.
# --------------------------------------------------------------------------- #
def _attn_kernel(qkv_ref, o_ref, *, n_heads, scale):
    qkv = qkv_ref[...]                                     # (Lp, 3*D)
    Lp, D3 = qkv.shape
    D = D3 // 3
    E = D // n_heads
    row = lax.broadcasted_iota(jnp.int32, (Lp, Lp), 0)
    col = lax.broadcasted_iota(jnp.int32, (Lp, Lp), 1)
    causal = col > row                                     # triu, diag=1
    ctx = []
    for h in range(n_heads):                               # unrolled at trace time
        qh = qkv[:, h * E:(h + 1) * E] * scale             # scale O(L*E), not O(L*L)
        kh = qkv[:, D + h * E:D + (h + 1) * E]
        vh = qkv[:, 2 * D + h * E:2 * D + (h + 1) * E]
        s = lax.dot_general(_mxu(qh), _mxu(kh), (((1,), (1,)), ((), ())),
                            preferred_element_type=jnp.float32)
        s = jnp.where(causal, -1e30, s)
        m = jnp.max(s, axis=-1, keepdims=True)
        p = jnp.exp(s - m)
        p = p * pl.reciprocal(jnp.sum(p, axis=-1, keepdims=True), approx=True)
        ctx.append(jnp.dot(_mxu(p), _mxu(vh), preferred_element_type=jnp.float32))
    o_ref[...] = jnp.concatenate(ctx, axis=-1)             # (Lp, D) lane-dense store


def pallas_causal_attention(qkv, batch, Lp, n_heads):
    rows, D3 = qkv.shape
    D = D3 // 3
    E = D // n_heads
    scale = 1.0 / math.sqrt(E)
    cost = pl.CostEstimate(
        flops=4 * batch * n_heads * Lp * Lp * E + 8 * batch * n_heads * Lp * Lp,
        transcendentals=batch * n_heads * Lp * Lp,
        bytes_accessed=4 * (rows * D3 + rows * D),
    )
    return pl.pallas_call(
        functools.partial(_attn_kernel, n_heads=n_heads, scale=scale),
        out_shape=jax.ShapeDtypeStruct((rows, D), jnp.float32),
        grid=(batch,),
        in_specs=[pl.BlockSpec((Lp, D3), lambda b: (b, 0))],
        out_specs=pl.BlockSpec((Lp, D), lambda b: (b, 0)),
        compiler_params=_compiler_params(),
        cost_estimate=cost,
    )(qkv)


# --------------------------------------------------------------------------- #
# Pallas kernel 4: out-projection + residual add + LayerNorm (fused epilogue)
# --------------------------------------------------------------------------- #
def _proj_add_ln_kernel(a_ref, res_ref, w_ref, b_ref, g_ref, be_ref, o_ref, *, eps):
    y = jnp.dot(_mxu(a_ref[...]), _mxu(w_ref[...]),
                preferred_element_type=jnp.float32) + b_ref[...] + res_ref[...]
    mu = jnp.mean(y, axis=-1, keepdims=True)
    yc = y - mu
    var = jnp.mean(yc * yc, axis=-1, keepdims=True)
    o_ref[...] = yc * lax.rsqrt(var + eps) * g_ref[...] + be_ref[...]


def pallas_proj_add_ln(a, res, w, b, gamma, beta, tile_m, eps=1e-5):
    M, K = a.shape
    N = w.shape[1]
    cost = pl.CostEstimate(flops=2 * M * K * N + 10 * M * N, transcendentals=M,
                           bytes_accessed=4 * (M * K + 2 * M * N + K * N + 3 * N))
    return pl.pallas_call(
        functools.partial(_proj_add_ln_kernel, eps=eps),
        out_shape=jax.ShapeDtypeStruct((M, N), jnp.float32),
        grid=(M // tile_m,),
        in_specs=[
            pl.BlockSpec((tile_m, K), lambda i: (i, 0)),
            pl.BlockSpec((tile_m, N), lambda i: (i, 0)),
            pl.BlockSpec((K, N), lambda i: (0, 0)),
            pl.BlockSpec((1, N), lambda i: (0, 0)),
            pl.BlockSpec((1, N), lambda i: (0, 0)),
            pl.BlockSpec((1, N), lambda i: (0, 0)),
        ],
        out_specs=pl.BlockSpec((tile_m, N), lambda i: (i, 0)),
        compiler_params=_compiler_params(),
        cost_estimate=cost,
    )(a, res, w, b.reshape(1, N), gamma.reshape(1, N), beta.reshape(1, N))


# --------------------------------------------------------------------------- #
# Pallas kernel 5: FFN1(relu) + FFN2 + residual add + LayerNorm (fully fused;
#   the (tile_m, d_ff) intermediate never leaves VMEM)
# --------------------------------------------------------------------------- #
def _ffn_add_ln_kernel(x_ref, w1_ref, b1_ref, w2_ref, b2_ref, g_ref, be_ref, o_ref, *, eps):
    x = x_ref[...]
    h = jnp.maximum(jnp.dot(_mxu(x), _mxu(w1_ref[...]),
                            preferred_element_type=jnp.float32) + b1_ref[...], 0.0)
    y = jnp.dot(_mxu(h), _mxu(w2_ref[...]),
                preferred_element_type=jnp.float32) + b2_ref[...] + x
    mu = jnp.mean(y, axis=-1, keepdims=True)
    yc = y - mu
    var = jnp.mean(yc * yc, axis=-1, keepdims=True)
    o_ref[...] = yc * lax.rsqrt(var + eps) * g_ref[...] + be_ref[...]


def pallas_ffn_add_ln(x, w1, b1, w2, b2, gamma, beta, tile_m, eps=1e-5):
    M, D = x.shape
    Fd = w1.shape[1]
    cost = pl.CostEstimate(flops=4 * M * D * Fd + 2 * M * Fd + 12 * M * D,
                           transcendentals=M,
                           bytes_accessed=4 * (2 * M * D + 2 * D * Fd + Fd + 3 * D))
    return pl.pallas_call(
        functools.partial(_ffn_add_ln_kernel, eps=eps),
        out_shape=jax.ShapeDtypeStruct((M, D), jnp.float32),
        grid=(M // tile_m,),
        in_specs=[
            pl.BlockSpec((tile_m, D), lambda i: (i, 0)),
            pl.BlockSpec((D, Fd), lambda i: (0, 0)),
            pl.BlockSpec((1, Fd), lambda i: (0, 0)),
            pl.BlockSpec((Fd, D), lambda i: (0, 0)),
            pl.BlockSpec((1, D), lambda i: (0, 0)),
            pl.BlockSpec((1, D), lambda i: (0, 0)),
            pl.BlockSpec((1, D), lambda i: (0, 0)),
        ],
        out_specs=pl.BlockSpec((tile_m, D), lambda i: (i, 0)),
        compiler_params=_compiler_params(),
        cost_estimate=cost,
    )(x, w1, b1.reshape(1, Fd), w2, b2.reshape(1, D),
      gamma.reshape(1, D), beta.reshape(1, D))


# --------------------------------------------------------------------------- #
# model composition (wrappers calling the kernels)
# --------------------------------------------------------------------------- #
def decoder_layer(x, lp, n_heads, batch, Lp, tile_m):
    """x: (batch*Lp, D) padded/flattened activations."""
    qkv = pallas_linear(x, lp["wqkv"], lp["bqkv"], tile_m)             # (rows, 3D)
    attn = pallas_causal_attention(qkv, batch, Lp, n_heads)            # (rows, D)
    xn = pallas_proj_add_ln(attn, x, lp["wo"], lp["bo"],
                            lp["ln1_g"], lp["ln1_b"], tile_m)          # norm1(x + attn@Wo)
    return pallas_ffn_add_ln(xn, lp["w1"], lp["b1"], lp["w2"], lp["b2"],
                             lp["ln2_g"], lp["ln2_b"], tile_m)         # norm2(xn + ffn)


def decoder_forward(x_dec, visit_len, x_mark, params, cfg):
    D = cfg["d_model"]
    H = cfg["n_heads"]
    B, L, c_in = x_dec.shape

    # --- DataEmbedding inputs (cheap XLA prep, computed once) ---
    # TokenEmbedding: circular conv(k=3) == [x[t-1], x[t], x[t+1]] @ W_flat
    xs = jnp.concatenate(
        [jnp.roll(x_dec, 1, axis=1), x_dec, jnp.roll(x_dec, -1, axis=1)], axis=-1
    ).astype(jnp.float32)                                              # (B, L, 3*c_in)

    # temporal + positional indices into the merged table (pre-offset)
    pos = jnp.arange(L, dtype=jnp.int32)[None, :]
    input_pos = jnp.where(pos < visit_len[:, None].astype(jnp.int32), pos + 1, 0)
    n_fields = int(params["field_offsets"].shape[0])
    idx = jnp.concatenate(
        [x_mark[..., :n_fields].astype(jnp.int32) + params["field_offsets"][None, None, :],
         (input_pos + params["pos_offset"])[..., None]], axis=-1)      # (B, L, F)

    # --- pad the sequence dim ONCE and carry the padded shape through all layers ---
    Lp = _round_up(max(L, 8), 8)
    if Lp != L:
        padL = [(0, 0), (0, Lp - L), (0, 0)]
        xs = jnp.pad(xs, padL)
        idx = jnp.pad(idx, padL)        # padded rows -> index 0 (benign, sliced off)
    rows = B * Lp
    tile_m = _pick_row_tile(rows)

    xs2 = xs.reshape(rows, -1)
    idx2 = idx.reshape(rows, -1)

    # fused token + temporal + positional embedding
    x = pallas_embedding(xs2, idx2, params["tok_w"], params["merged_table"], tile_m)

    # --- decoder layers ---
    for lp_ in params["layers"]:
        x = decoder_layer(x, lp_, H, B, Lp, tile_m)

    return x.reshape(B, Lp, D)[:, :L, :]


# --------------------------------------------------------------------------- #
# parameter construction (deterministic)
# --------------------------------------------------------------------------- #
def init_params(key, cfg, max_len: int = 500):
    D = cfg["d_model"]
    c_in = cfg["dec_in"]
    d_ff = 4 * D
    n_layers = cfg["d_layers"]

    keys = jax.random.split(key, 1 + n_layers)
    tok_w = jax.random.normal(keys[0], (3 * c_in, D), jnp.float32) / math.sqrt(3 * c_in)

    # merged embedding table: [month, day, weekday, hour, (minute)] + positional
    sizes = [13, 32, 7, 24] + ([60] if cfg["freq"] == "t" else [])
    tabs = [fixed_embedding_table(s, D) for s in sizes]
    pos_tab = positional_table(D, max_len)
    offs, o = [], 0
    for s in sizes:
        offs.append(o)
        o += s
    pos_offset = o
    merged = jnp.concatenate(tabs + [pos_tab], axis=0)
    Kp = _round_up(merged.shape[0], 128)                   # pad rows to full lane group
    merged = jnp.concatenate(
        [merged, jnp.zeros((Kp - merged.shape[0], D), jnp.float32)], axis=0
    )

    layers = []
    for li in range(n_layers):
        lk = jax.random.split(keys[1 + li], 12)

        def lin(kk, m, n):
            return jax.random.normal(kk, (m, n), jnp.float32) / math.sqrt(m)

        wq, bq = lin(lk[0], D, D), 0.01 * jax.random.normal(lk[1], (D,), jnp.float32)
        wk, bk = lin(lk[2], D, D), 0.01 * jax.random.normal(lk[3], (D,), jnp.float32)
        wv, bv = lin(lk[4], D, D), 0.01 * jax.random.normal(lk[5], (D,), jnp.float32)
        layers.append(dict(
            wq=wq, bq=bq, wk=wk, bk=bk, wv=wv, bv=bv,
            # fused QKV weight/bias used by the Pallas path (lane-dense 3D output)
            wqkv=jnp.concatenate([wq, wk, wv], axis=1),
            bqkv=jnp.concatenate([bq, bk, bv], axis=0),
            wo=lin(lk[6], D, D), bo=0.01 * jax.random.normal(lk[7], (D,), jnp.float32),
            w1=lin(lk[8], D, d_ff), b1=0.01 * jax.random.normal(lk[9], (d_ff,), jnp.float32),
            w2=lin(lk[10], d_ff, D), b2=0.01 * jax.random.normal(lk[11], (D,), jnp.float32),
            ln1_g=jnp.ones((D,), jnp.float32), ln1_b=jnp.zeros((D,), jnp.float32),
            ln2_g=jnp.ones((D,), jnp.float32), ln2_b=jnp.zeros((D,), jnp.float32),
        ))

    return dict(
        tok_w=tok_w,
        merged_table=merged,
        field_offsets=jnp.array(offs, jnp.int32),
        pos_offset=pos_offset,
        temporal_tables=tabs,
        pos_table=pos_tab,
        layers=layers,
    )


# --------------------------------------------------------------------------- #
# pure-JAX reference of the PyTorch forward (inference mode)
# --------------------------------------------------------------------------- #
_HI = jax.lax.Precision.HIGHEST


def _mm(a, b):
    return jnp.dot(a, b, precision=_HI)


def _ln_ref(x, g, b, eps=1e-5):
    mu = jnp.mean(x, -1, keepdims=True)
    var = jnp.mean((x - mu) ** 2, -1, keepdims=True)
    return (x - mu) / jnp.sqrt(var + eps) * g + b


def reference_decoder(x_dec, visit_len, x_mark, params, cfg):
    D = cfg["d_model"]
    H = cfg["n_heads"]
    B, L, c_in = x_dec.shape
    E = D // H

    xs = jnp.concatenate(
        [jnp.roll(x_dec, 1, axis=1), x_dec, jnp.roll(x_dec, -1, axis=1)], axis=-1
    )
    x1 = _mm(xs.reshape(B * L, 3 * c_in), params["tok_w"]).reshape(B, L, D)
    tabs = params["temporal_tables"]
    x2 = sum(tabs[f][x_mark[..., f]] for f in range(len(tabs)))
    pos = jnp.arange(L, dtype=jnp.int32)[None, :]
    input_pos = jnp.where(pos < visit_len[:, None].astype(jnp.int32), pos + 1, 0)
    x3 = params["pos_table"][input_pos]
    x = x1 + x2 + x3

    scale = 1.0 / math.sqrt(E)
    row = jnp.arange(L)[:, None]
    col = jnp.arange(L)[None, :]
    neg = jnp.finfo(jnp.float32).min
    for lp in params["layers"]:
        x2d = x.reshape(B * L, D)
        q = (_mm(x2d, lp["wq"]) + lp["bq"]).reshape(B, L, H, E)
        k = (_mm(x2d, lp["wk"]) + lp["bk"]).reshape(B, L, H, E)
        v = (_mm(x2d, lp["wv"]) + lp["bv"]).reshape(B, L, H, E)
        s = jnp.einsum("blhe,bshe->bhls", q, k, precision=_HI)
        s = jnp.where(col > row, neg, s)
        A = jax.nn.softmax(scale * s, axis=-1)
        o = jnp.einsum("bhls,bshd->blhd", A, v, precision=_HI).reshape(B, L, D)
        attn_out = _mm(o.reshape(B * L, D), lp["wo"]) + lp["bo"]
        xr = x2d + attn_out
        xr = _ln_ref(xr, lp["ln1_g"], lp["ln1_b"])
        y = jnp.maximum(_mm(xr, lp["w1"]) + lp["b1"], 0.0)
        y = _mm(y, lp["w2"]) + lp["b2"]
        x = _ln_ref(xr + y, lp["ln2_g"], lp["ln2_b"]).reshape(B, L, D)
    return x


# --------------------------------------------------------------------------- #
if __name__ == "__main__":
    cfg = {"dec_in": 4, "d_model": 32, "n_heads": 4, "d_layers": 2,
           "embed": "fixed", "freq": "h", "dropout": 0.1}
    B, L = 2, 8

    key = jax.random.PRNGKey(0)
    kx, km, kp = jax.random.split(key, 3)

    x_dec = jax.random.normal(kx, (B, L, cfg["dec_in"]), jnp.float32)
    mk = jax.random.split(km, 4)
    month = jax.random.randint(mk[0], (B, L), 0, 13)
    day = jax.random.randint(mk[1], (B, L), 0, 32)
    weekday = jax.random.randint(mk[2], (B, L), 0, 7)
    hour = jax.random.randint(mk[3], (B, L), 0, 24)
    x_mark = jnp.stack([month, day, weekday, hour], axis=-1).astype(jnp.int32)
    visit_len = jnp.array([L, 5], dtype=jnp.int32)

    params = init_params(kp, cfg)

    out = decoder_forward(x_dec, visit_len, x_mark, params, cfg)
    out = jax.block_until_ready(out)

    ref = reference_decoder(x_dec, visit_len, x_mark, params, cfg)
    assert out.shape == (B, L, cfg["d_model"])
    max_err = float(jnp.max(jnp.abs(out - ref)))
    # tolerance accounts for the approximate (EUP) reciprocal used in the softmax
    assert jnp.allclose(out, ref, atol=1e-2, rtol=1e-2), f"max abs err {max_err}"
    print("KERNEL_OK")
</pallas_src>

<mosaic_0001>
module attributes {stable_mosaic.version = 11 : i64} {
  func.func @_embed_kernel(%arg0: i32, %arg1: memref<8x12xf32, #tpu.memory_space<vmem>>, %arg2: memref<8x5xi32, #tpu.memory_space<vmem>>, %arg3: memref<12x32xf32, #tpu.memory_space<vmem>>, %arg4: memref<640x32xf32, #tpu.memory_space<vmem>>, %arg5: memref<8x32xf32, #tpu.memory_space<vmem>>) attributes {dimension_semantics = [#tpu.dimension_semantics<parallel>], iteration_bounds = array<i64: 2>, scalar_prefetch = 0 : i64, scratch_operands = 0 : i64, tpu.core_type = #tpu.core_type<tc>, window_params = [{transform_indices = @transform_0, window_bounds = array<i64: 8, 12>}, {transform_indices = @transform_1, window_bounds = array<i64: 8, 5>}, {pipeline_mode = #tpu.pipeline_mode<synchronous>, transform_indices = @transform_2, window_bounds = array<i64: 12, 32>}, {pipeline_mode = #tpu.pipeline_mode<synchronous>, transform_indices = @transform_3, window_bounds = array<i64: 640, 32>}, {transform_indices = @transform_4, window_bounds = array<i64: 8, 32>}]} {
    %c0 = arith.constant 0 : index
    %c0_0 = arith.constant 0 : index
    %0 = vector.load %arg1[%c0, %c0_0] : memref<8x12xf32, #tpu.memory_space<vmem>>, vector<8x12xf32>
    %c0_1 = arith.constant 0 : index
    %c0_2 = arith.constant 0 : index
    %1 = vector.load %arg3[%c0_1, %c0_2] : memref<12x32xf32, #tpu.memory_space<vmem>>, vector<12x32xf32>
    %cst = arith.constant dense<0.000000e+00> : vector<8x32xf32>
    %2 = tpu.matmul %0, %1, %cst {dimension_numbers = #tpu.dot_dimension_numbers<[1], [0], [0], [1], [0, 0, 1, 1], [], []>} : vector<8x12xf32>, vector<12x32xf32>, vector<8x32xf32> -> vector<8x32xf32>
    %c0_3 = arith.constant 0 : index
    %c0_4 = arith.constant 0 : index
    %3 = vector.load %arg2[%c0_3, %c0_4] : memref<8x5xi32, #tpu.memory_space<vmem>>, vector<8x5xi32>
    %4 = tpu.iota {dimensions = array<i32: 2>} : vector<8x5x640xi32>
    %5 = vector.shape_cast %3 : vector<8x5xi32> to vector<8x5x1xi32>
    %6 = vector.broadcast %5 : vector<8x5x1xi32> to vector<8x5x640xi32>
    %7 = arith.cmpi eq, %6, %4 : vector<8x5x640xi32>
    %8 = arith.extui %7 : vector<8x5x640xi1> to vector<8x5x640xi32>
    %9 = arith.sitofp %8 : vector<8x5x640xi32> to vector<8x5x640xf32>
    %cst_5 = arith.constant dense<0.000000e+00> : vector<8x640xf32>
    %10 = vector.multi_reduction <add>, %9, %cst_5 [1] : vector<8x5x640xf32> to vector<8x640xf32>
    %c0_6 = arith.constant 0 : index
    %c0_7 = arith.constant 0 : index
    %11 = vector.load %arg4[%c0_6, %c0_7] : memref<640x32xf32, #tpu.memory_space<vmem>>, vector<640x32xf32>
    %cst_8 = arith.constant dense<0.000000e+00> : vector<8x32xf32>
    %12 = tpu.matmul %10, %11, %cst_8 {dimension_numbers = #tpu.dot_dimension_numbers<[1], [0], [0], [1], [0, 0, 1, 1], [], []>} : vector<8x640xf32>, vector<640x32xf32>, vector<8x32xf32> -> vector<8x32xf32>
    %13 = arith.addf %2, %12 : vector<8x32xf32>
    %c0_9 = arith.constant 0 : index
    %c0_10 = arith.constant 0 : index
    %14 = vector.load %arg5[%c0_9, %c0_10] : memref<8x32xf32, #tpu.memory_space<vmem>>, vector<8x32xf32>
    tpu.vector_store %arg5[%c0_9, %c0_10], %13 {strides = array<i32>} : memref<8x32xf32, #tpu.memory_space<vmem>>, vector<8x32xf32>,
    return
  }
  func.func @transform_0(%arg0: i32) -> (i32, i32) {
    %c0_i32 = arith.constant 0 : i32
    %c0_i32_0 = arith.constant 0 : i32
    return %arg0, %c0_i32 : i32, i32
  }
  func.func @transform_1(%arg0: i32) -> (i32, i32) {
    %c0_i32 = arith.constant 0 : i32
    %c0_i32_0 = arith.constant 0 : i32
    return %arg0, %c0_i32 : i32, i32
  }
  func.func @transform_2(%arg0: i32) -> (i32, i32) {
    %c0_i32 = arith.constant 0 : i32
    %c0_i32_0 = arith.constant 0 : i32
    %c0_i32_1 = arith.constant 0 : i32
    return %c0_i32, %c0_i32_0 : i32, i32
  }
  func.func @transform_3(%arg0: i32) -> (i32, i32) {
    %c0_i32 = arith.constant 0 : i32
    %c0_i32_0 = arith.constant 0 : i32
    %c0_i32_1 = arith.constant 0 : i32
    return %c0_i32, %c0_i32_0 : i32, i32
  }
  func.func @transform_4(%arg0: i32) -> (i32, i32) {
    %c0_i32 = arith.constant 0 : i32
    %c0_i32_0 = arith.constant 0 : i32
    return %arg0, %c0_i32 : i32, i32
  }
}

</mosaic_0001>

<bundles_post_ra>
// kernel: tpu_custom_call.1
= control target key start
LH: loop header
LB: loop body
LE: loop exit
PB: predicated region body
PF: predicated region fallthrough
CT: control target
= control target key end

     0   :  { %9 = vsyncpa [#allocation3], 0  ;;  %s2384_s0 = inlined_call_operand.vmem [shape: f32[16,12], index: 0, kind: input, shape index: {}]   ;;  %s2385_s1 = inlined_call_operand.vmem [shape: s32[16,5], index: 1, kind: input, shape index: {}]   ;;  %s2386_s2 = inlined_call_operand.vmem [shape: f32[12,32], index: 2, kind: input, shape index: {}]   ;;  %s2387_s3 = inlined_call_operand.vmem [shape: f32[640,32], index: 3, kind: input, shape index: {}]   ;;  %s2388_s4 = inlined_call_operand.hbm [shape: f32[16,32], index: 4, kind: output, shape index: {}]  }
   0x1   :  { %11 = vsyncpa [#allocation3 + $0x1], 0  ;;  %s1636_s15 = smov 0   ;;  %s1638_s16 = smov 0  }
   0x2   :  { %s1640_s17 = smov 0   ;;  %s1642_s18 = smov 0  }
   0x3 LB: > { %s1657_s19 = sadd.s32 4294967295, %s1604_s18   ;;  %s1219_s20 = sadd.s32 4294967294, %s1604_s18   ;;  %s1604_s18 = sphi %s1642_s18, %s2430_s18   ;;  %s1600_s17 = sphi %s1640_s17, %s2429_s17   ;;  %s1596_s16 = sphi %s1638_s16, %s2428_s16   ;;  %s1592_s15 = sphi %s1636_s15, %s2427_s15  }
   0x4   : > { %s1661_s21 = sadd.s32 1, %s1604_s18   ;;  %s118_s22 = sadd.s32 1, %s1600_s17 }
   0x5   : > { %s115_s23 = ssub.s32 %s1604_s18, %s1661_s21  ;;  %p128_p0 = scmp.ne.s32.totalorder %s1600_s17, %s1596_s16 }
   0x6   : > { %p116_p1 = scmp.eq.s32.totalorder %s115_s23, 0  ;;  %p129_p2 = scmp.eq.s32.totalorder %s1657_s19, 1 }
   0x7   : > { %p134_p3 = scmp.ne.s32.totalorder %s1596_s16, %s1592_s15  ;;  %p135_p4 = scmp.eq.s32.totalorder %s1219_s20, 1 }
   0x8   : > { %s1672_s24 = scalar_select %p116_p1, %s1600_s17, %s118_s22  }
   0x9   : > { %p1674_p5 = por %p129_p2, %p128_p0  ;;  %p1678_p6 = por %p135_p4, %p134_p3 }
   0xa   : > { %p1222_p7 = scmp.ge.s32.totalorder %s1604_s18, 1  ;;  %p173_p8 = scmp.lt.s32.totalorder %s1604_s18, 3 }
   0xc   : > { %p174_p9 = pnand %p1222_p7, %p173_p8 }
   0xe   : > { %177 = sbr.rel (%p174_p9) target bundleno = 500 (0x1f4), region = 36 }
  0x15   : > { %p202_p10 = scmp.lt.s32.totalorder %s1657_s19, 1  ;;  %v214_v0 = vlaneseq  ;;  %v693_v1 = vld [vmem:[%s2387_s3 + $0x80] sm:$0xff]  ;;  %v694_v2 = vld [vmem:[%s2387_s3 + $0x88] sm:$0xff]  ;;  %v1606_v5 = vmov 0.0|0.0   ;;  %v695_v19 = vld [vmem:[%s2387_s3 + $0x90] sm:$0xff]  ;;  %vm1607_vm0 = vmmov 0  }
  0x16   : > { %v677_v3 = vld [vmem:[%s2387_s3] sm:$0xff]  ;;  %v1404_v4 = vpack.c.bf16 %v694_v2, %v693_v1  ;;  %1468 = vmatprep.subr.bf16.mxu0 %v1606_v5  ;;  %v678_v6 = vld [vmem:[%s2387_s3 + $0x8] sm:$0xff]  ;;  %v696_v20 = vld [vmem:[%s2387_s3 + $0x98] sm:$0xff]  ;;  %vm396_vm1 = vcmask 1044480  }
  0x17   : > { %v741_v7 = vld [vmem:[%s2387_s3 + $0x200] sm:$0xff]  ;;  %v742_v8 = vld [vmem:[%s2387_s3 + $0x208] sm:$0xff]  ;;  %s1705_s13 = scalar_select %p202_p10, %s1657_s19, 1  ;;  %v221_v9 = vshrl.u32 %v214_v0, 7  ;;  %v1406_v10 = vpack.c.bf16 %v678_v6, %v677_v3  ;;  %v679_v23 = vld [vmem:[%s2387_s3 + $0x10] sm:$0xff]  ;;  %v1408_v28 = vpack.c.bf16 %v696_v20, %v695_v19 }
  0x18   : > { %v1469_v11 = vpack.c.bf16 %v742_v8, %v741_v7  ;;  %1405 = vmatprep.subr.bf16.mxu1 %v1404_v4  ;;  %v680_v24 = vld [vmem:[%s2387_s3 + $0x18] sm:$0xff]  ;;  %v743_v25 = vld [vmem:[%s2387_s3 + $0x210] sm:$0xff]  ;;  %v697_v38 = vld [vmem:[%s2387_s3 + $0xa0] sm:$0xff] }
  0x19   : > { %s1224_s14 = sshll.u32 %s1705_s13, 3  ;;  %v236_v12 = vsub.s32 2, %v221_v9  ;;  %v222_v13 = vsub.s32 0, %v221_v9  ;;  %v243_v14 = vsub.s32 3, %v221_v9  ;;  %1407 = vmatpush3.bf16.msra.mxu1 %v1406_v10  ;;  %v229_v15 = vsub.s32 1, %v221_v9  ;;  %v744_v30 = vld [vmem:[%s2387_s3 + $0x218] sm:$0xff] }
  0x1a   : > { %1470 = vmatpush3.bf16.msra.mxu0 %v1469_v11  ;;  %s209_s23 = scalar_lea.vmem %s2385_s1, %s1224_s14  ;;  %v257_v22 = vsub.s32 5, %v221_v9  ;;  %v250_v27 = vsub.s32 4, %v221_v9  ;;  %v1410_v29 = vpack.c.bf16 %v680_v24, %v679_v23  ;;  %v1472_v31 = vpack.c.bf16 %v744_v30, %v743_v25  ;;  %1409 = vmatprep.subr.bf16.mxu1 %v1408_v28  ;;  %v698_v39 = vld [vmem:[%s2387_s3 + $0xa8] sm:$0xff]  ;;  %v681_v41 = vld [vmem:[%s2387_s3 + $0x20] sm:$0xff]  ;;  %v699_v47 = vld [vmem:[%s2387_s3 + $0xb0] sm:$0xff]  ;;  %s205_s28 = scalar_lea.vmem %s2384_s0, %s1224_s14 }
  0x1b   : > { %1471 = vmatprep.subr.bf16.mxu0 %v1606_v5  ;;  %v213_v16 = vld [vmem:[%s209_s23] sm:$0xff]  ;;  %v271_v34 = vsub.s32 7, %v221_v9  ;;  %v264_v35 = vsub.s32 6, %v221_v9  ;;  %v1412_v40 = vpack.c.bf16 %v698_v39, %v697_v38  ;;  %v682_v42 = vld [vmem:[%s2387_s3 + $0x28] sm:$0xff]  ;;  %v700_v48 = vld [vmem:[%s2387_s3 + $0xb8] sm:$0xff]  ;;  %s199_s23 = sand.u32 1, %s1596_s16  }
  0x1c   : > { %v237_v17 = vrot.slane %v213_v16, %v236_v12  ;;  %v223_v18 = vrot.slane %v213_v16, %v222_v13  ;;  %v244_v21 = vrot.slane %v213_v16, %v243_v14  ;;  %v230_v26 = vrot.slane %v213_v16, %v229_v15  ;;  %v745_v43 = vld [vmem:[%s2387_s3 + $0x220] sm:$0xff]  ;;  %v746_v45 = vld [vmem:[%s2387_s3 + $0x228] sm:$0xff]  ;;  %v683_v50 = vld [vmem:[%s2387_s3 + $0x30] sm:$0xff]  ;;  %s1223_s27 = sshll.u32 %s199_s23, 3  ;;  %s1135_s6 = scalar_lea.sflag [#allocation3], %s199_s23 }
  0x1d   : > { %1411 = vmatpush3.bf16.msra.mxu1 %v1410_v29  ;;  %v258_v32 = vrot.slane %v213_v16, %v257_v22  ;;  %v251_v33 = vrot.slane %v213_v16, %v250_v27  ;;  %v272_v36 = vrot.slane %v213_v16, %v271_v34  ;;  %v265_v37 = vrot.slane %v213_v16, %v264_v35  ;;  %v684_v51 = vld [vmem:[%s2387_s3 + $0x38] sm:$0xff]  ;;  %v747_v52 = vld [vmem:[%s2387_s3 + $0x230] sm:$0xff]  ;;  %v701_v56 = vld [vmem:[%s2387_s3 + $0xc0] sm:$0xff]  ;;  %s201_s13 = scalar_lea.vmem [#allocation2], %s1223_s27 }
  0x1e   : > { %239 = vbcast.lane.b32.xlu1 %v237_v17, 256  ;;  %225 = vbcast.lane.b32.xlu0 %v223_v18, 256  ;;  %v1414_v44 = vpack.c.bf16 %v682_v42, %v681_v41  ;;  %v1475_v46 = vpack.c.bf16 %v746_v45, %v745_v43  ;;  %v1416_v49 = vpack.c.bf16 %v700_v48, %v699_v47  ;;  %v748_v54 = vld [vmem:[%s2387_s3 + $0x238] sm:$0xff]  ;;  %v702_v57 = vld [vmem:[%s2387_s3 + $0xc8] sm:$0xff]  ;;  %v685_v59 = vld [vmem:[%s2387_s3 + $0x40] sm:$0xff]  ;;  %v2390_v27 = vmov 0.0  }
  0x1f   : > { %1473 = vmatpush3.bf16.msra.mxu0 %v1472_v31  ;;  %1413 = vmatprep.subr.bf16.mxu1 %v1412_v40  ;;  %v1418_v53 = vpack.c.bf16 %v684_v51, %v683_v50  ;;  %v1478_v55 = vpack.c.bf16 %v748_v54, %v747_v52  ;;  %v1420_v58 = vpack.c.bf16 %v702_v57, %v701_v56  ;;  %v686_v60 = vld [vmem:[%s2387_s3 + $0x48] sm:$0xff]  ;;  %v749_v61 = vld [vmem:[%s2387_s3 + $0x240] sm:$0xff]  ;;  %v703_v2 = vld [vmem:[%s2387_s3 + $0xd0] sm:$0xff]  ;;  %v1857_v34 = vand.u32 127, %v214_v0  ;;  %s1148_s14 = sshll.u32 %s201_s13, 4  ;;  %s2344_s14 = int_to_ptr.vmem [resolvable:$true] %s1148_s14 }
  0x20   : > { %1474 = vmatprep.subr.bf16.mxu0 %v1606_v5  ;;  %v1422_v62 = vpack.c.bf16 %v686_v60, %v685_v59  ;;  %v750_v63 = vld [vmem:[%s2387_s3 + $0x248] sm:$0xff]  ;;  %v704_v3 = vld [vmem:[%s2387_s3 + $0xd8] sm:$0xff]  ;;  %v687_v6 = vld [vmem:[%s2387_s3 + $0x50] sm:$0xff]  ;;  %1394 = vmatprep.mubr.msk.f32.mxu0 %vm1607_vm0, %v2390_v27  ;;  %s1542_s7 = scalar_lea.vmem %s2344_s14, 128 }
  0x21   : > { %1415 = vmatpush3.bf16.msra.mxu1 %v1414_v44  ;;  %v1481_v1 = vpack.c.bf16 %v750_v63, %v749_v61  ;;  %v1424_v4 = vpack.c.bf16 %v704_v3, %v703_v2  ;;  %v688_v7 = vld [vmem:[%s2387_s3 + $0x58] sm:$0xff]  ;;  %v751_v8 = vld [vmem:[%s2387_s3 + $0x250] sm:$0xff]  ;;  %v705_v12 = vld [vmem:[%s2387_s3 + $0xe0] sm:$0xff]  ;;  %v1860_v35 = vadd.s32 128, %v1857_v34  ;;  %v1880_v45 = vadd.s32 256, %v1857_v34  ;;  %p1543_p11 = scmp.ne.s32.totalorder %s2344_s14, %s1542_s7 }
  0x22   : > { %246 = vbcast.lane.b32.xlu1 %v244_v21, 256  ;;  %232 = vbcast.lane.b32.xlu0 %v230_v26, 256  ;;  %v1426_v9 = vpack.c.bf16 %v688_v7, %v687_v6  ;;  %v752_v10 = vld [vmem:[%s2387_s3 + $0x258] sm:$0xff]  ;;  %v706_v13 = vld [vmem:[%s2387_s3 + $0xe8] sm:$0xff]  ;;  %v689_v15 = vld [vmem:[%s2387_s3 + $0x60] sm:$0xff] }
  0x23   : > { %1476 = vmatpush3.bf16.msra.mxu0 %v1475_v46  ;;  %1417 = vmatprep.subr.bf16.mxu1 %v1416_v49  ;;  %v1484_v11 = vpack.c.bf16 %v752_v10, %v751_v8  ;;  %v1428_v14 = vpack.c.bf16 %v706_v13, %v705_v12  ;;  %v690_v16 = vld [vmem:[%s2387_s3 + $0x68] sm:$0xff]  ;;  %v753_v17 = vld [vmem:[%s2387_s3 + $0x260] sm:$0xff]  ;;  %v707_v20 = vld [vmem:[%s2387_s3 + $0xf0] sm:$0xff]  ;;  %p1544_p12 = pnand %p1543_p11, %p1674_p5 }
  0x24   : > { %1477 = vmatprep.subr.bf16.mxu0 %v1606_v5  ;;  %v1430_v18 = vpack.c.bf16 %v690_v16, %v689_v15  ;;  %v754_v19 = vld [vmem:[%s2387_s3 + $0x268] sm:$0xff]  ;;  %v708_v21 = vld [vmem:[%s2387_s3 + $0xf8] sm:$0xff]  ;;  %v691_v24 = vld [vmem:[%s2387_s3 + $0x70] sm:$0xff] }
  0x25   : > { %1419 = vmatpush3.bf16.msra.mxu1 %v1418_v53  ;;  %v1487_v22 = vpack.c.bf16 %v754_v19, %v753_v17  ;;  %v1432_v23 = vpack.c.bf16 %v708_v21, %v707_v20  ;;  %v692_v25 = vld [vmem:[%s2387_s3 + $0x78] sm:$0xff]  ;;  %v755_v26 = vld [vmem:[%s2387_s3 + $0x270] sm:$0xff]  ;;  %v725_v31 = vld [vmem:[%s2387_s3 + $0x180] sm:$0xff]  ;;  %p1545_p13 = pneg %p1544_p12 }
  0x26   : > { %260 = vbcast.lane.b32.xlu1 %v258_v32, 256  ;;  %253 = vbcast.lane.b32.xlu0 %v251_v33, 256  ;;  %v1434_v28 = vpack.c.bf16 %v692_v25, %v691_v24  ;;  %v756_v29 = vld [vmem:[%s2387_s3 + $0x278] sm:$0xff]  ;;  %v726_v32 = vld [vmem:[%s2387_s3 + $0x188] sm:$0xff]  ;;  %v1902_v61 = vld [vmem:[%s2387_s3 + $0x100] sm:$0xff] }
  0x27   : > { %1479 = vmatpush3.bf16.msra.mxu0 %v1478_v55  ;;  %1421 = vmatprep.subr.bf16.mxu1 %v1420_v58  ;;  %v1490_v30 = vpack.c.bf16 %v756_v29, %v755_v26  ;;  %v1436_v33 = vpack.c.bf16 %v726_v32, %v725_v31  ;;  %v1921_v6 = vld [vmem:[%s2387_s3 + $0x198] sm:$0xff]  ;;  %v1952_v24 = vld [vmem:[%s2386_s2 + $0x8] sm:$0xf] }
  0x28   : > { %1480 = vmatprep.subr.bf16.mxu0 %v1606_v5  ;;  %v1933_v12 = vld [vmem:[%s2387_s3 + $0x118] sm:$0xff] }
  0x29   : > { %1423 = vmatpush3.bf16.msra.mxu1 %v1422_v62  ;;  %v1907_v62 = vld [vmem:[%s2387_s3 + $0x108] sm:$0xff]  ;;  %2403 = vst [vmem:[#allocation7_spill] sm:$0xff] %v1933_v12 }
  0x2a   : > { %274 = vbcast.lane.b32.xlu1 %v272_v36, 256  ;;  %267 = vbcast.lane.b32.xlu0 %v265_v37, 256  ;;  %v1863_v36 = vadd.s32 384, %v1857_v34  ;;  %v1866_v37 = vadd.s32 512, %v1857_v34 }
  0x2b   : > { %1482 = vmatpush3.bf16.msra.mxu0 %v1481_v1  ;;  %1425 = vmatprep.subr.bf16.mxu1 %v1424_v4  ;;  %v1916_v4 = vld [vmem:[%s2387_s3 + $0x190] sm:$0xff] }
  0x2c   : > { %1483 = vmatprep.subr.bf16.mxu0 %v1606_v5  ;;  %2401 = vst [vmem:[#allocation5_spill] sm:$0xff] %v1916_v4 }
  0x2d   : > { %1427 = vmatpush3.bf16.msra.mxu1 %v1426_v9 }
  0x2e   : > { %1429 = vmatprep.subr.bf16.mxu1 %v1428_v14 }
  0x2f   : > { %1485 = vmatpush3.bf16.msra.mxu0 %v1484_v11  ;;  %v1928_v11 = vld [vmem:[%s2387_s3 + $0x110] sm:$0xff] }
  0x30   : > { %1486 = vmatprep.subr.bf16.mxu0 %v1606_v5  ;;  %2402 = vst [vmem:[#allocation6_spill] sm:$0xff] %v1928_v11 }
  0x31   : > { %1431 = vmatpush3.bf16.msra.mxu1 %v1430_v18 }
  0x32   : > { %1433 = vmatprep.subr.bf16.mxu1 %v1432_v23  ;;  %v1947_v23 = vld [vmem:[%s2386_s2] sm:$0xff] }
  0x33   : > { %1488 = vmatpush3.bf16.msra.mxu0 %v1487_v22 }
  0x34   : > { %1489 = vmatprep.subr.bf16.mxu0 %v1606_v5 }
  0x35   : > { %1435 = vmatpush3.bf16.msra.mxu1 %v1434_v28 }
  0x36   : > { %1437 = vmatprep.subr.bf16.mxu1 %v1436_v33 }
  0x37   : > { %1491 = vmatpush3.bf16.msra.mxu0 %v1490_v30 }
  0x38   : > { %1492 = vmatprep.subr.bf16.mxu0 %v1606_v5 }
  0x90   : > { %v240_v38 = vpop.permute.xlu1 %239  ;;  %v1883_v47 = vpop.permute.xlu0 %225 }
  0x91   : > { %vm286_vm2 = vcmp.eq.s32.totalorder %v240_v38, %v1857_v34  ;;  %vm287_vm3 = vcmp.eq.s32.totalorder %v240_v38, %v1860_v35  ;;  %vm289_vm4 = vcmp.eq.s32.totalorder %v240_v38, %v1863_v36  ;;  %vm290_vm5 = vcmp.eq.s32.totalorder %v240_v38, %v1866_v37 }
  0x92   : > { %v1236_v0 = vsel %vm286_vm2, 1.0, %v2390_v27  ;;  %v1239_v5 = vsel %vm289_vm4, 1.0, %v2390_v27  ;;  %v1237_v40 = vsel %vm287_vm3, 1.0, %v2390_v27  ;;  %v1240_v41 = vsel %vm290_vm5, 1.0, %v2390_v27 }
  0x93   : > { %v467_v39 = vsel %vm396_vm1, %v1236_v0, 0.0  ;;  %v488_v43 = vsel %vm396_vm1, %v1239_v5, 0.0  ;;  %v474_v44 = vsel %vm396_vm1, %v1237_v40, 0.0  ;;  %v495_v46 = vsel %vm396_vm1, %v1240_v41, 0.0 }
  0x94   : > { %v468_v42 = vrot.slane %v467_v39, 4  ;;  %v489_v48 = vrot.slane %v488_v43, 4  ;;  %v475_v50 = vrot.slane %v474_v44, 4  ;;  %v496_v51 = vrot.slane %v495_v46, 4  ;;  %v1911_v3 = vpop.permute.xlu1 %246  ;;  %v233_v40 = vpop.permute.xlu0 %232 }
  0x95   : > { %vm276_vm6 = vcmp.eq.s32.totalorder %v1883_v47, %v1857_v34  ;;  %vm277_vm7 = vcmp.eq.s32.totalorder %v1883_v47, %v1860_v35  ;;  %vm288_vm8 = vcmp.eq.s32.totalorder %v240_v38, %v1880_v45  ;;  %vm279_vm9 = vcmp.eq.s32.totalorder %v1883_v47, %v1863_v36 }
  0x96   : > { %v469_v49 = vadd.f32 %v468_v42, %v467_v39  ;;  %v490_v52 = vadd.f32 %v489_v48, %v488_v43  ;;  %vm280_vm10 = vcmp.eq.s32.totalorder %v1883_v47, %v1866_v37  ;;  %v476_v54 = vadd.f32 %v475_v50, %v474_v44 }
  0x97   : > { %v1226_v55 = vsel %vm276_vm6, 1.0, %v2390_v27  ;;  %v1227_v56 = vsel %vm277_vm7, 1.0, %v2390_v27  ;;  %v1238_v57 = vsel %vm288_vm8, 1.0, %v2390_v27  ;;  %v497_v58 = vadd.f32 %v496_v51, %v495_v46 }
  0x98   : > { %v470_v53 = vrot.slane %v469_v49, 2  ;;  %v1229_v59 = vsel %vm279_vm9, 1.0, %v2390_v27  ;;  %v1230_v60 = vsel %vm280_vm10, 1.0, %v2390_v27  ;;  %v491_v63 = vrot.slane %v490_v52, 2 }
  0x99   : > { %v397_v1 = vsel %vm396_vm1, %v1226_v55, 0.0  ;;  %v404_v2 = vsel %vm396_vm1, %v1227_v56, 0.0  ;;  %v477_v8 = vrot.slane %v476_v54, 2  ;;  %v481_v9 = vsel %vm396_vm1, %v1238_v57, 0.0 }
  0x9a   : > { %v471_v7 = vadd.f32 %v470_v53, %v469_v49  ;;  %v418_v10 = vsel %vm396_vm1, %v1229_v59, 0.0  ;;  %v498_v13 = vrot.slane %v497_v58, 2  ;;  %v425_v14 = vsel %vm396_vm1, %v1230_v60, 0.0 }
  0x9b   : > { %v398_v16 = vrot.slane %v397_v1, 4  ;;  %v405_v17 = vrot.slane %v404_v2, 4  ;;  %vm291_vm11 = vcmp.eq.s32.totalorder %v1911_v3, %v1857_v34  ;;  %v482_v19 = vrot.slane %v481_v9, 4 }
  0x9c   : > { %v492_v20 = vadd.f32 %v491_v63, %v490_v52  ;;  %v419_v21 = vrot.slane %v418_v10, 4  ;;  %v472_v25 = vrot.slane %v471_v7, 1  ;;  %v1954_v26 = vadd.f32 %v477_v8, %v476_v54 }
  0x9d   : > { %v426_v28 = vrot.slane %v425_v14, 4  ;;  %vm292_vm12 = vcmp.eq.s32.totalorder %v1911_v3, %v1860_v35  ;;  %v1958_v29 = vadd.f32 %v498_v13, %v497_v58  ;;  %vm294_vm13 = vcmp.eq.s32.totalorder %v1911_v3, %v1863_v36 }
  0x9e   : > { %vm295_vm14 = vcmp.eq.s32.totalorder %v1911_v3, %v1866_v37  ;;  %v1241_v30 = vsel %vm291_vm11, 1.0, %v2390_v27  ;;  %vm278_vm15 = vcmp.eq.s32.totalorder %v1883_v47, %v1880_v45  ;;  %v399_v31 = vadd.f32 %v398_v16, %v397_v1 }
  0x9f   : > { %v406_v32 = vadd.f32 %v405_v17, %v404_v2  ;;  %v1969_v38 = vadd.f32 %v482_v19, %v481_v9  ;;  %v493_v0 = vrot.slane %v492_v20, 1  ;;  %v420_v5 = vadd.f32 %v419_v21, %v418_v10 }
  0xa0   : > { %v1242_v39 = vsel %vm292_vm12, 1.0, %v2390_v27  ;;  %v427_v41 = vadd.f32 %v426_v28, %v425_v14  ;;  %v1244_v42 = vsel %vm294_vm13, 1.0, %v2390_v27  ;;  %v1245_v43 = vsel %vm295_vm14, 1.0, %v2390_v27 }
  0xa1   : > { %2404 = vst [vmem:[#allocation8_spill] sm:$0xff] %v1969_v38  ;;  %v502_v44 = vsel %vm396_vm1, %v1241_v30, 0.0  ;;  %v1975_v46 = vadd.f32 %v472_v25, %v471_v7  ;;  %v500_v49 = vrot.slane %v1958_v29, 1  ;;  %v1228_v50 = vsel %vm278_vm15, 1.0, %v2390_v27 }
  0xa2   : > { %v400_v51 = vrot.slane %v399_v31, 2  ;;  %v407_v52 = vrot.slane %v406_v32, 2  ;;  %v509_v53 = vsel %vm396_vm1, %v1242_v39, 0.0  ;;  %vm281_vm2 = vcmp.eq.s32.totalorder %v233_v40, %v1857_v34 }
  0xa3   : > { %v503_v54 = vrot.slane %v502_v44, 4  ;;  %v523_v55 = vsel %vm396_vm1, %v1244_v42, 0.0  ;;  %v530_v56 = vsel %vm396_vm1, %v1245_v43, 0.0  ;;  %vm282_vm3 = vcmp.eq.s32.totalorder %v233_v40, %v1860_v35 }
  0xa4   : > { %v1988_v57 = vadd.f32 %v493_v0, %v492_v20  ;;  %v411_v58 = vsel %vm396_vm1, %v1228_v50, 0.0  ;;  %v421_v59 = vrot.slane %v420_v5, 2  ;;  %v428_v47 = vrot.slane %v427_v41, 2 }
  0xa5   : > { %vm283_vm4 = vcmp.eq.s32.totalorder %v233_v40, %v1880_v45  ;;  %vm284_vm5 = vcmp.eq.s32.totalorder %v233_v40, %v1863_v36  ;;  %vm285_vm6 = vcmp.eq.s32.totalorder %v233_v40, %v1866_v37  ;;  %v1231_v60 = vsel %vm281_vm2, 1.0, %v2390_v27 }
  0xa6   : > { %v510_v63 = vrot.slane %v509_v53, 4  ;;  %v524_v1 = vrot.slane %v523_v55, 4  ;;  %v531_v2 = vrot.slane %v530_v56, 4  ;;  %v1232_v7 = vsel %vm282_vm3, 1.0, %v2390_v27 }
  0xa7   : > { %v401_v8 = vadd.f32 %v400_v51, %v399_v31  ;;  %v408_v9 = vadd.f32 %v407_v52, %v406_v32  ;;  %vm293_vm7 = vcmp.eq.s32.totalorder %v1911_v3, %v1880_v45  ;;  %v504_v10 = vadd.f32 %v503_v54, %v502_v44 }
  0xa8   : > { %v1233_v13 = vsel %vm283_vm4, 1.0, %v2390_v27  ;;  %v1234_v14 = vsel %vm284_vm5, 1.0, %v2390_v27  ;;  %v1235_v16 = vsel %vm285_vm6, 1.0, %v2390_v27  ;;  %v432_v17 = vsel %vm396_vm1, %v1231_v60, 0.0 }
  0xa9   : > { %v422_v19 = vadd.f32 %v421_v59, %v420_v5  ;;  %v429_v20 = vadd.f32 %v428_v47, %v427_v41  ;;  %v433_v21 = vrot.slane %v432_v17, 4  ;;  %v439_v25 = vsel %vm396_vm1, %v1232_v7, 0.0 }
  0xaa   : > { %v511_v28 = vadd.f32 %v510_v63, %v509_v53  ;;  %v525_v30 = vadd.f32 %v524_v1, %v523_v55  ;;  %v532_v31 = vadd.f32 %v531_v2, %v530_v56  ;;  %v440_v32 = vrot.slane %v439_v25, 4 }
  0xab   : > { %v434_v0 = vadd.f32 %v433_v21, %v432_v17  ;;  %v446_v39 = vsel %vm396_vm1, %v1233_v13, 0.0  ;;  %v453_v40 = vsel %vm396_vm1, %v1234_v14, 0.0  ;;  %v460_v42 = vsel %vm396_vm1, %v1235_v16, 0.0 }
  0xac   : > { %v402_v43 = vrot.slane %v401_v8, 1  ;;  %v409_v44 = vrot.slane %v408_v9, 1  ;;  %v412_v50 = vrot.slane %v411_v58, 4  ;;  %v505_v51 = vrot.slane %v504_v10, 2 }
  0xad   : > { %v423_v5 = vrot.slane %v422_v19, 1  ;;  %v1243_v41 = vsel %vm293_vm7, 1.0, %v2390_v27  ;;  %v441_v52 = vadd.f32 %v440_v32, %v439_v25  ;;  %v454_v53 = vrot.slane %v453_v40, 4 }
  0xae   : > { %v526_v54 = vrot.slane %v525_v30, 2  ;;  %v533_v55 = vrot.slane %v532_v31, 2  ;;  %v447_v56 = vrot.slane %v446_v39, 4  ;;  %v461_v59 = vrot.slane %v460_v42, 4 }
  0xaf   : > { %v2011_v47 = vadd.f32 %v500_v49, %v1958_v29  ;;  %v430_v60 = vrot.slane %v429_v20, 1  ;;  %v512_v63 = vrot.slane %v511_v28, 2  ;;  %v435_v1 = vrot.slane %v434_v0, 2  ;;  %v261_v29 = vpop.permute.xlu1 %260 }
  0xb0   : > { %v2013_v2 = vadd.f32 %v402_v43, %v401_v8  ;;  %v2015_v7 = vadd.f32 %v412_v50, %v411_v58  ;;  %v2017_v13 = vadd.f32 %v505_v51, %v504_v10  ;;  %v2020_v3 = vsel %vm396_vm1, %v1243_v41, 0.0 }
  0xb1   : > { %2405 = vst [vmem:[#allocation9_spill] sm:$0xff] %v2020_v3  ;;  %v2022_v14 = vadd.f32 %v409_v44, %v408_v9  ;;  %v2024_v16 = vadd.f32 %v423_v5, %v422_v19  ;;  %v442_v17 = vrot.slane %v441_v52, 2  ;;  %v455_v21 = vadd.f32 %v454_v53, %v453_v40 }
  0xb2   : > { %v2026_v49 = vadd.f32 %v526_v54, %v525_v30  ;;  %v2028_v25 = vadd.f32 %v533_v55, %v532_v31  ;;  %v2030_v8 = vadd.f32 %v447_v56, %v446_v39  ;;  %v462_v58 = vadd.f32 %v461_v59, %v460_v42  ;;  %v254_v30 = vpop.permute.xlu0 %253 }
  0xb3   : > { %v2032_v32 = vadd.f32 %v430_v60, %v429_v20  ;;  %v2034_v10 = vadd.f32 %v512_v63, %v511_v28  ;;  %v436_v9 = vadd.f32 %v435_v1, %v434_v0  ;;  %vm301_vm8 = vcmp.eq.s32.totalorder %v261_v29, %v1857_v34 }
  0xb4   : > { %2406 = vst [vmem:[#allocation10_spill] sm:$0xff] %v2030_v8  ;;  %vm302_vm9 = vcmp.eq.s32.totalorder %v261_v29, %v1860_v35  ;;  %vm304_vm10 = vcmp.eq.s32.totalorder %v261_v29, %v1863_v36  ;;  %v443_v31 = vadd.f32 %v442_v17, %v441_v52  ;;  %v456_v39 = vrot.slane %v455_v21, 2 }
  0xb5   : > { %vm303_vm11 = vcmp.eq.s32.totalorder %v261_v29, %v1880_v45  ;;  %vm305_vm12 = vcmp.eq.s32.totalorder %v261_v29, %v1866_v37  ;;  %v463_v40 = vrot.slane %v462_v58, 2  ;;  %v437_v42 = vrot.slane %v436_v9, 1 }
  0xb6   : > { %v1251_v44 = vsel %vm301_vm8, 1.0, %v2390_v27  ;;  %v1254_v50 = vsel %vm304_vm10, 1.0, %v2390_v27  ;;  %vm296_vm13 = vcmp.eq.s32.totalorder %v254_v30, %v1857_v34  ;;  %v1252_v51 = vsel %vm302_vm9, 1.0, %v2390_v27 }
  0xb7   : > { %v2051_v5 = vsel %vm303_vm11, 1.0, %v2390_v27  ;;  %v1255_v41 = vsel %vm305_vm12, 1.0, %v2390_v27  ;;  %vm297_vm14 = vcmp.eq.s32.totalorder %v254_v30, %v1860_v35  ;;  %v444_v52 = vrot.slane %v443_v31, 1 }
  0xb8   : > { %v457_v53 = vadd.f32 %v456_v39, %v455_v21  ;;  %vm299_vm15 = vcmp.eq.s32.totalorder %v254_v30, %v1863_v36  ;;  %vm300_vm2 = vcmp.eq.s32.totalorder %v254_v30, %v1866_v37  ;;  %v464_v54 = vadd.f32 %v463_v40, %v462_v58  ;;  %v2069_v40 = vpop.permute.xlu1 %274 }
  0xb9   : > { %v572_v55 = vsel %vm396_vm1, %v1251_v44, 0.0  ;;  %v593_v56 = vsel %vm396_vm1, %v1254_v50, 0.0  ;;  %v1246_v59 = vsel %vm296_vm13, 1.0, %v2390_v27  ;;  %v600_v60 = vsel %vm396_vm1, %v1255_v41, 0.0 }
  0xba   : > { %v1247_v63 = vsel %vm297_vm14, 1.0, %v2390_v27  ;;  %v1249_v1 = vsel %vm299_vm15, 1.0, %v2390_v27  ;;  %v1250_v17 = vsel %vm300_vm2, 1.0, %v2390_v27  ;;  %v2064_v21 = vadd.f32 %v437_v42, %v436_v9 }
  0xbb   : > { %v579_v29 = vsel %vm396_vm1, %v1252_v51, 0.0  ;;  %v537_v58 = vsel %vm396_vm1, %v1246_v59, 0.0  ;;  %v544_v39 = vsel %vm396_vm1, %v1247_v63, 0.0  ;;  %v573_v44 = vrot.slane %v572_v55, 4 }
  0xbc   : > { %v594_v50 = vrot.slane %v593_v56, 4  ;;  %v538_v22 = vrot.slane %v537_v58, 4  ;;  %v558_v41 = vsel %vm396_vm1, %v1249_v1, 0.0  ;;  %v458_v0 = vrot.slane %v457_v53, 1 }
  0xbd   : > { %v601_v43 = vrot.slane %v600_v60, 4  ;;  %v559_v18 = vrot.slane %v558_v41, 4  ;;  %v565_v15 = vsel %vm396_vm1, %v1250_v17, 0.0  ;;  %v465_v9 = vrot.slane %v464_v54, 1 }
  0xbe   : > { %v545_v42 = vrot.slane %v544_v39, 4  ;;  %v566_v33 = vrot.slane %v565_v15, 4  ;;  %vm311_vm3 = vcmp.eq.s32.totalorder %v2069_v40, %v1857_v34  ;;  %v2075_v51 = vadd.f32 %v444_v52, %v443_v31 }
  0xbf   : > { %vm298_vm4 = vcmp.eq.s32.totalorder %v254_v30, %v1880_v45  ;;  %v539_v59 = vadd.f32 %v538_v22, %v537_v58  ;;  %v560_v63 = vadd.f32 %v559_v18, %v558_v41  ;;  %v2078_v20 = vadd.f32 %v573_v44, %v572_v55 }
  0xc0   : > { %v580_v1 = vrot.slane %v579_v29, 4  ;;  %v2080_v19 = vadd.f32 %v594_v50, %v593_v56  ;;  %vm314_vm5 = vcmp.eq.s32.totalorder %v2069_v40, %v1863_v36  ;;  %v2084_v17 = vadd.f32 %v458_v0, %v457_v53 }
  0xc1   : > { %v2086_v28 = vadd.f32 %v601_v43, %v600_v60  ;;  %v567_v48 = vadd.f32 %v566_v33, %v565_v15  ;;  %v1261_v31 = vsel %vm311_vm3, 1.0, %v2390_v27  ;;  %v2089_v52 = vadd.f32 %v465_v9, %v464_v54  ;;  %v2097_v43 = vpop.permute.xlu0 %267 }
  0xc2   : > { %v1248_v22 = vsel %vm298_vm4, 1.0, %v2390_v27  ;;  %v546_v18 = vadd.f32 %v545_v42, %v544_v39  ;;  %vm315_vm6 = vcmp.eq.s32.totalorder %v2069_v40, %v1866_v37  ;;  %v540_v30 = vrot.slane %v539_v59, 2 }
  0xc3   : > { %v561_v55 = vrot.slane %v560_v63, 2  ;;  %vm312_vm7 = vcmp.eq.s32.totalorder %v2069_v40, %v1860_v35  ;;  %v1264_v0 = vsel %vm314_vm5, 1.0, %v2390_v27  ;;  %v581_v33 = vadd.f32 %v580_v1, %v579_v29 }
  0xc4   : > { %v642_v54 = vsel %vm396_vm1, %v1261_v31, 0.0  ;;  %v2104_v60 = vsel %vm396_vm1, %v1248_v22, 0.0  ;;  %v568_v58 = vrot.slane %v567_v48, 2  ;;  %v1265_v39 = vsel %vm315_vm6, 1.0, %v2390_v27 }
  0xc5   : > { %v547_v44 = vrot.slane %v546_v18, 2  ;;  %v1262_v50 = vsel %vm312_vm7, 1.0, %v2390_v27  ;;  %v663_v41 = vsel %vm396_vm1, %v1264_v0, 0.0  ;;  %vm306_vm8 = vcmp.eq.s32.totalorder %v2097_v43, %v1857_v34 }
  0xc6   : > { %vm797_vm9 = vcmask 1041409   ;;  %v2111_v29 = vadd.f32 %v540_v30, %v539_v59  ;;  %v2113_v9 = vadd.f32 %v561_v55, %v560_v63  ;;  %v643_v42 = vrot.slane %v642_v54, 4 }
  0xc7   : > { %vm307_vm10 = vcmp.eq.s32.totalorder %v2097_v43, %v1860_v35  ;;  %vm799_vm11 = vcmask 1042434   ;;  %v670_v1 = vsel %vm396_vm1, %v1265_v39, 0.0  ;;  %vm309_vm12 = vcmp.eq.s32.totalorder %v2097_v43, %v1863_v36 }
  0xc8   : > { %vm310_vm13 = vcmp.eq.s32.totalorder %v2097_v43, %v1866_v37  ;;  %v1256_v34 = vsel %vm306_vm8, 1.0, %v2390_v27  ;;  %vm801_vm14 = vcmask 1043459   ;;  %v569_v59 = vadd.f32 %v568_v58, %v567_v48 }
  0xc9   : > { %v649_v63 = vsel %vm396_vm1, %v1262_v50, 0.0  ;;  %v664_v31 = vrot.slane %v663_v41, 4  ;;  %v1257_v22 = vsel %vm307_vm10, 1.0, %v2390_v27  ;;  %vm803_vm15 = vcmask 1044484  }
  0xca   : > { %v1259_v35 = vsel %vm309_vm12, 1.0, %v2390_v27  ;;  %v1260_v30 = vsel %vm310_vm13, 1.0, %v2390_v27  ;;  %v607_v55 = vsel %vm396_vm1, %v1256_v34, 0.0  ;;  %v614_v36 = vsel %vm396_vm1, %v1257_v22, 0.0 }
  0xcb   : > { %v671_v0 = vrot.slane %v670_v1, 4  ;;  %v608_v37 = vrot.slane %v607_v55, 4  ;;  %v615_v39 = vrot.slane %v614_v36, 4  ;;  %v628_v53 = vsel %vm396_vm1, %v1259_v35, 0.0 }
  0xcc   : > { %vm805_vm2 = vcmask 1045509   ;;  %v2130_v48 = vadd.f32 %v643_v42, %v642_v54  ;;  %v650_v58 = vrot.slane %v649_v63, 4  ;;  %v629_v50 = vrot.slane %v628_v53, 4 }
  0xcd   : > { %v635_v15 = vsel %vm396_vm1, %v1260_v30, 0.0  ;;  %vm807_vm3 = vcmask 1046534   ;;  %v609_v56 = vadd.f32 %v608_v37, %v607_v55  ;;  %v616_v11 = vadd.f32 %v615_v39, %v614_v36 }
  0xce   : > { %v636_v27 = vrot.slane %v635_v15, 4  ;;  %v514_v34 = vrot.slane %v2034_v10, 1  ;;  %v2134_v12 = vadd.f32 %v664_v31, %v663_v41  ;;  %v2136_v22 = vadd.f32 %v629_v50, %v628_v53 }
  0xcf   : > { %v548_v8 = vadd.f32 %v547_v44, %v546_v18  ;;  %v582_v3 = vrot.slane %v581_v33, 2  ;;  %v672_v35 = vadd.f32 %v671_v0, %v670_v1  ;;  %v2407_v54 = vrot.slane %v1954_v26, 1 }
  0xd0   : > { %v637_v38 = vadd.f32 %v636_v27, %v635_v15  ;;  %v617_v4 = vrot.slane %v616_v11, 2  ;;  %v610_v30 = vrot.slane %v609_v56, 2  ;;  %v515_v55 = vadd.f32 %v514_v34, %v2034_v10 }
  0xd1   : > { %v480_v42 = vadd.f32 %v2407_v54, %v1954_v26  ;;  %v549_v36 = vrot.slane %v548_v8, 1  ;;  %v583_v37 = vadd.f32 %v582_v3, %v581_v33  ;;  %vm809_vm4 = vcmask 1047559  }
  0xd2   : > { %v638_v39 = vrot.slane %v637_v38, 2  ;;  %v618_v41 = vadd.f32 %v617_v4, %v616_v11  ;;  %v651_v31 = vadd.f32 %v650_v58, %v649_v63  ;;  %v811_v18 = vsel %vm797_vm9, %v2075_v51, %v2022_v14 }
  0xd3   : > { %vm1058_vm5 = vcmask 1043456   ;;  %v631_v27 = vrot.slane %v2136_v22, 2  ;;  %v550_v15 = vadd.f32 %v549_v36, %v548_v8  ;;  %v584_v53 = vrot.slane %v583_v37, 1 }
  0xd4   : > { %v812_v26 = vsel %vm799_vm11, %v480_v42, %v811_v18  ;;  %v619_v44 = vrot.slane %v618_v41, 1  ;;  %v652_v1 = vrot.slane %v651_v31, 2  ;;  %v2408_v3 = vrot.slane %v2028_v25, 1 }
  0xd5   : > { %v813_v10 = vsel %vm801_vm14, %v515_v55, %v812_v26  ;;  %v585_v11 = vadd.f32 %v584_v53, %v583_v37  ;;  %v570_v63 = vrot.slane %v569_v59, 1  ;;  %v2409_v14 = vrot.slane %v2086_v28, 2 }
  0xd6   : > { %v536_v4 = vadd.f32 %v2408_v3, %v2028_v25  ;;  %v814_v33 = vsel %vm803_vm15, %v550_v15, %v813_v10  ;;  %v620_v8 = vadd.f32 %v619_v44, %v618_v41  ;;  %v653_v0 = vadd.f32 %v652_v1, %v651_v31 }
  0xd7   : > { %v604_v51 = vadd.f32 %v2409_v14, %v2086_v28  ;;  %v639_v58 = vadd.f32 %v638_v39, %v637_v38  ;;  %v673_v50 = vrot.slane %v672_v35, 2  ;;  %v815_v34 = vsel %vm805_vm2, %v585_v11, %v814_v33 }
  0xd8   : > { %v571_v54 = vadd.f32 %v570_v63, %v569_v59  ;;  %v832_v25 = vsel %vm797_vm9, %v2089_v52, %v2032_v32  ;;  %vm308_vm6 = vcmp.eq.s32.totalorder %v2097_v43, %v1880_v45  ;;  %v654_v55 = vrot.slane %v653_v0, 1  ;;  %v730_v43 = vld [vmem:[%s2387_s3 + $0x1a8] sm:$0xff] }
  0xd9   : > { %v605_v42 = vrot.slane %v604_v51, 1  ;;  %v816_v36 = vsel %vm807_vm3, %v620_v8, %v815_v34  ;;  %v640_v37 = vrot.slane %v639_v58, 1  ;;  %v674_v28 = vadd.f32 %v673_v50, %v672_v35 }
  0xda   : > { %v833_v38 = vsel %vm799_vm11, %v2011_v47, %v832_v25  ;;  %v2410_v59 = vrot.slane %v2017_v13, 1  ;;  %v542_v31 = vrot.slane %v2111_v29, 1  ;;  %v655_v18 = vadd.f32 %v654_v55, %v653_v0 }
  0xdb   : > { %v606_v41 = vadd.f32 %v605_v42, %v604_v51  ;;  %v641_v32 = vadd.f32 %v640_v37, %v639_v58  ;;  %v675_v52 = vrot.slane %v674_v28, 1  ;;  %v834_v15 = vsel %vm801_vm14, %v536_v4, %v833_v38  ;;  %v210_v38 = vld [vmem:[%s205_s28] sm:$0xff]  ;;  %s1269_s28 = sshll.u32 %s1657_s19, 7  ;;  %s1610_s19 = smov [#allocation2]  }
  0xdc   : > { %v508_v39 = vadd.f32 %v2410_v59, %v2017_v13  ;;  %v835_v53 = vsel %vm803_vm15, %v571_v54, %v834_v15  ;;  %v543_v26 = vadd.f32 %v542_v31, %v2111_v29  ;;  %v2411_v35 = vrot.slane %v2078_v20, 2  ;;  %s2342_s5 = scalar_lea.hbm %s2388_s4, %s1269_s28  ;;  %s1546_s8 = sshll.u32 %s1610_s19, 4  ;;  %s1547_s8 = int_to_ptr.vmem [resolvable:$false] %s1546_s8 }
  0xdd   : > { %v611_v47 = vadd.f32 %v610_v30, %v609_v56  ;;  %v817_v1 = vsel %vm809_vm4, %v655_v18, %v816_v36  ;;  %v676_v10 = vadd.f32 %v675_v52, %v674_v28  ;;  %v836_v13 = vsel %vm805_vm2, %v606_v41, %v835_v53  ;;  %v729_v41 = vld [vmem:[%s2387_s3 + $0x1a0] sm:$0xff]  ;;  %s1548_s9 = scalar_lea.vmem %s1547_s8, 256  ;;  %p1549_p0 = scmp.lt.s32.totalorder %s2344_s14, %s1547_s8 }
  0xde   : > { %v576_v44 = vadd.f32 %v2411_v35, %v2078_v20  ;;  %v645_v3 = vrot.slane %v2130_v48, 2  ;;  %vm1054_vm7 = vcmask 97280   ;;  %908 = vmatprep.mubr.f32.mxu1 %v817_v1  ;;  %v837_v4 = vsel %vm807_vm3, %v641_v32, %v836_v13  ;;  %v2422_v13 = vld [vmem:[#allocation10_spill] sm:$0xff]  ;;  %p1550_p1 = scmp.lt.s32.totalorder %s1548_s9, %s1542_s7 }
  0xdf   : > { %v612_v33 = vrot.slane %v611_v47, 1  ;;  %v798_v29 = vsel %vm797_vm9, %v2064_v21, %v2013_v2  ;;  %vm1609_vm8 = vmmov 1   ;;  %v838_v20 = vsel %vm809_vm4, %v676_v10, %v837_v4 }
  0xe0   : > { %v577_v11 = vrot.slane %v576_v44, 1  ;;  %vm1494_vm10 = vmpackc.low %vm1058_vm5, %vm1609_vm8  ;;  %v646_v56 = vadd.f32 %v645_v3, %v2130_v48  ;;  %v800_v30 = vsel %vm799_vm11, %v1975_v46, %v798_v29  ;;  %v2412_v63 = vrot.slane %v2026_v49, 1  ;;  %1395 = vmatmul.mubr.f32.vlgmr.msra.gmra.mrb[0].mxu0 %v838_v20  ;;  %p1551_p2 = por %p1550_p1, %p1549_p0 }
  0xe1   : > { %v613_v8 = vadd.f32 %v612_v33, %v611_v47  ;;  %v802_v2 = vsel %vm801_vm14, %v508_v39, %v800_v30  ;;  %v563_v21 = vrot.slane %v2113_v9, 1  ;;  %v2413_v48 = vrot.slane %v2080_v19, 2  ;;  %v2420_v47 = vld [vmem:[#allocation9_spill] sm:$0xff]  ;;  %v732_v33 = vld [vmem:[%s2387_s3 + $0x1b8] sm:$0xff] }
  0xe2   : > { %v529_v14 = vadd.f32 %v2412_v63, %v2026_v49  ;;  %v578_v51 = vadd.f32 %v577_v11, %v576_v44  ;;  %v647_v0 = vrot.slane %v646_v56, 1  ;;  %v804_v58 = vsel %vm803_vm15, %v543_v26, %v802_v2  ;;  %v2417_v26 = vld [vmem:[#allocation5_spill] sm:$0xff]  ;;  %p1552_p3 = pnand %p1551_p2, %p1545_p13 }
  0xe3   : > { %v597_v50 = vadd.f32 %v2413_v48, %v2080_v19  ;;  %v632_v46 = vadd.f32 %v631_v27, %v2136_v22  ;;  %v2414_v49 = vpack.c.bf16 %v1952_v24, %v1947_v23  ;;  %v2415_v34 = vmov 0.0   ;;  %v731_v11 = vld [vmem:[%s2387_s3 + $0x1b0] sm:$0xff] }
  0xe4   : > { %1401 = vmatprep.mubr.msk.f32.mxu0 %vm1607_vm0, %v2415_v34  ;;  %v806_v54 = vsel %vm805_vm2, %v578_v51, %v804_v58  ;;  %v564_v42 = vadd.f32 %v563_v21, %v2113_v9  ;;  %v666_v25 = vrot.slane %v2134_v12, 2  ;;  %v825_v55 = vsel %vm797_vm9, %v2084_v17, %v2024_v16  ;;  %v2425_v51 = vld [vmem:[#allocation6_spill] sm:$0xff] }
  0xe5   : > { %1495 = vmatpush3.bf16.msk.msra.mxu0 %vm1494_vm10, %v2414_v49  ;;  %v648_v23 = vadd.f32 %v647_v0, %v646_v56  ;;  %v808_v24 = vsel %vm807_vm3, %v613_v8, %v806_v54  ;;  %v598_v19 = vrot.slane %v597_v50, 1  ;;  %v633_v22 = vrot.slane %v632_v46, 1  ;;  %v715_v0 = vld [vmem:[%s2387_s3 + $0x130] sm:$0xff]  ;;  %v734_v49 = vld [vmem:[%s2387_s3 + $0x1c8] sm:$0xff] }
  0xe6   : > { %vm313_vm0 = vcmp.eq.s32.totalorder %v2069_v40, %v1880_v45  ;;  %v1258_v9 = vsel %vm308_vm6, 1.0, %v2415_v34  ;;  %v667_v16 = vadd.f32 %v666_v25, %v2134_v12  ;;  %v826_v17 = vsel %vm799_vm11, %v1988_v57, %v825_v55  ;;  %v713_v45 = vld [vmem:[%s2387_s3 + $0x120] sm:$0xff] }
  0xe7   : > { %v810_v27 = vsel %vm809_vm4, %v648_v23, %v808_v24  ;;  %v599_v36 = vadd.f32 %v598_v19, %v597_v50  ;;  %v634_v37 = vadd.f32 %v633_v22, %v632_v46  ;;  %v827_v28 = vsel %vm801_vm14, %v529_v14, %v826_v17  ;;  %v2424_v14 = vld [vmem:[#allocation7_spill] sm:$0xff]  ;;  %v718_v19 = vld [vmem:[%s2387_s3 + $0x148] sm:$0xff] }
  0xe8   : > { %v586_v12 = vsel %vm396_vm1, %v2051_v5, 0.0  ;;  %v552_v57 = vrot.slane %v2104_v60, 4  ;;  %909 = vmatmul.mubr.f32.vlgmr.msra.gmra.mrb[0].mxu1 %v810_v27  ;;  %v668_v59 = vrot.slane %v667_v16, 1  ;;  %v828_v39 = vsel %vm803_vm15, %v564_v42, %v827_v28  ;;  %1402 = vmatmul.mubr.msk.f32.vlgmr.msra.gmra.mrb[0].mxu0 %vm1054_vm7, %v210_v38  ;;  %v733_v46 = vld [vmem:[%s2387_s3 + $0x1c0] sm:$0xff]  ;;  %v735_v27 = vld [vmem:[%s2387_s3 + $0x1d0] sm:$0xff] }
  0xe9   : > { %v414_v31 = vrot.slane %v2015_v7, 2  ;;  %v1263_v18 = vsel %vm313_vm0, 1.0, %v2415_v34  ;;  %v621_v32 = vsel %vm396_vm1, %v1258_v9, 0.0  ;;  %v2416_v52 = vpack.c.bf16 %v1907_v62, %v1902_v61  ;;  %v714_v61 = vld [vmem:[%s2387_s3 + $0x128] sm:$0xff]  ;;  %v717_v24 = vld [vmem:[%s2387_s3 + $0x140] sm:$0xff] }
  0xea   : > { %v829_v5 = vsel %vm805_vm2, %v599_v36, %v828_v39  ;;  %v669_v15 = vadd.f32 %v668_v59, %v667_v16  ;;  %v2418_v35 = vpack.c.bf16 %v1921_v6, %v2417_v26  ;;  %v1444_v44 = vpack.c.bf16 %v730_v43, %v729_v41  ;;  %v2419_v62 = vld [vmem:[#allocation8_spill] sm:$0xff]  ;;  %v736_v36 = vld [vmem:[%s2387_s3 + $0x1d8] sm:$0xff] }
  0xeb   : > { %1439 = vmatpush3.bf16.msra.mxu1 %v2416_v52  ;;  %v830_v53 = vsel %vm807_vm3, %v634_v37, %v829_v5  ;;  %v484_v40 = vrot.slane %v2419_v62, 2  ;;  %v2421_v1 = vrot.slane %v2420_v47, 4  ;;  %v2423_v6 = vrot.slane %v2422_v13, 2  ;;  %v720_v59 = vld [vmem:[%s2387_s3 + $0x158] sm:$0xff]  ;;  %v738_v52 = vld [vmem:[%s2387_s3 + $0x1e8] sm:$0xff] }
  0xec   : > { %1441 = vmatprep.subr.bf16.mxu1 %v2418_v35  ;;  %v587_v4 = vrot.slane %v586_v12, 4  ;;  %v553_v29 = vadd.f32 %v552_v57, %v2104_v60  ;;  %v656_v20 = vsel %vm396_vm1, %v1263_v18, 0.0  ;;  %v622_v56 = vrot.slane %v621_v32, 4  ;;  %v716_v60 = vld [vmem:[%s2387_s3 + $0x138] sm:$0xff]  ;;  %v719_v57 = vld [vmem:[%s2387_s3 + $0x150] sm:$0xff] }
  0xed   : > { %v518_v10 = vadd.f32 %v2421_v1, %v2420_v47  ;;  %v450_v3 = vadd.f32 %v2423_v6, %v2422_v13  ;;  %v831_v30 = vsel %vm809_vm4, %v669_v15, %v830_v53  ;;  %v415_v63 = vadd.f32 %v414_v31, %v2015_v7  ;;  %v739_v47 = vld [vmem:[%s2387_s3 + $0x1f0] sm:$0xff]  ;;  %v740_v1 = vld [vmem:[%s2387_s3 + $0x1f8] sm:$0xff] }
  0xee   : > { %978 = vmatprep.mubr.f32.mxu1 %v831_v30  ;;  %v2426_v8 = vpack.c.bf16 %v2424_v14, %v2425_v51  ;;  %v1446_v2 = vpack.c.bf16 %v714_v61, %v713_v45  ;;  %v1448_v21 = vpack.c.bf16 %v732_v33, %v731_v11  ;;  %v588_v50 = vadd.f32 %v587_v4, %v586_v12  ;;  %v721_v45 = vld [vmem:[%s2387_s3 + $0x160] sm:$0xff]  ;;  %v722_v61 = vld [vmem:[%s2387_s3 + $0x168] sm:$0xff] }
  0xef   : > { %v519_v58 = vrot.slane %v518_v10, 2  ;;  %v451_v48 = vrot.slane %v450_v3, 1  ;;  %v657_v7 = vrot.slane %v656_v20, 4  ;;  %v485_v34 = vadd.f32 %v484_v40, %v2419_v62 }
  0xf0   : > { %1443 = vmatpush3.bf16.msra.mxu1 %v2426_v8  ;;  %v554_v54 = vrot.slane %v553_v29, 2  ;;  %v623_v42 = vadd.f32 %v622_v56, %v621_v32  ;;  %v416_v25 = vrot.slane %v415_v63, 1  ;;  %v1450_v55 = vpack.c.bf16 %v716_v60, %v715_v0  ;;  %v737_v32 = vld [vmem:[%s2387_s3 + $0x1e0] sm:$0xff] }
  0xf1   : > { %1445 = vmatprep.subr.bf16.mxu1 %v1444_v44  ;;  %v1452_v23 = vpack.c.bf16 %v734_v49, %v733_v46  ;;  %v520_v22 = vadd.f32 %v519_v58, %v518_v10  ;;  %v452_v9 = vadd.f32 %v451_v48, %v450_v3  ;;  %v589_v16 = vrot.slane %v588_v50, 2 }
  0xf2   : > { %v658_v17 = vadd.f32 %v657_v7, %v656_v20  ;;  %v486_v37 = vrot.slane %v485_v34, 1  ;;  %v555_v28 = vadd.f32 %v554_v54, %v553_v29  ;;  %v624_v41 = vrot.slane %v623_v42, 2  ;;  %v723_v29 = vld [vmem:[%s2387_s3 + $0x170] sm:$0xff]  ;;  %v724_v20 = vld [vmem:[%s2387_s3 + $0x178] sm:$0xff] }
  0xf3   : > { %v417_v43 = vadd.f32 %v416_v25, %v415_v63  ;;  %v1454_v38 = vpack.c.bf16 %v718_v19, %v717_v24  ;;  %v1456_v12 = vpack.c.bf16 %v736_v36, %v735_v27  ;;  %v521_v39 = vrot.slane %v520_v22, 1 }
  0xf4   : > { %1447 = vmatpush3.bf16.msra.mxu1 %v1446_v2  ;;  %v590_v31 = vadd.f32 %v589_v16, %v588_v50  ;;  %v659_v18 = vrot.slane %v658_v17, 2  ;;  %v487_v15 = vadd.f32 %v486_v37, %v485_v34  ;;  %v556_v53 = vrot.slane %v555_v28, 1 }
  0xf5   : > { %1449 = vmatprep.subr.bf16.mxu1 %v1448_v21  ;;  %v818_v5 = vsel %vm797_vm9, %v452_v9, %v417_v43  ;;  %v625_v26 = vadd.f32 %v624_v41, %v623_v42  ;;  %v1458_v35 = vpack.c.bf16 %v720_v59, %v719_v57  ;;  %v1460_v44 = vpack.c.bf16 %v738_v52, %v737_v32 }
  0xf6   : > { %v819_v62 = vsel %vm799_vm11, %v487_v15, %v818_v5  ;;  %v522_v40 = vadd.f32 %v521_v39, %v520_v22  ;;  %v591_v10 = vrot.slane %v590_v31, 1  ;;  %v660_v13 = vadd.f32 %v659_v18, %v658_v17 }
  0xf7   : > { %v557_v6 = vadd.f32 %v556_v53, %v555_v28  ;;  %v626_v3 = vrot.slane %v625_v26, 1  ;;  %v1462_v4 = vpack.c.bf16 %v722_v61, %v721_v45  ;;  %v1464_v33 = vpack.c.bf16 %v740_v1, %v739_v47 }
  0xf8   : > { %1451 = vmatpush3.bf16.msra.mxu1 %v1450_v55  ;;  %v820_v11 = vsel %vm801_vm14, %v522_v40, %v819_v62  ;;  %v592_v56 = vadd.f32 %v591_v10, %v590_v31  ;;  %v661_v30 = vrot.slane %v660_v13, 1  ;;  %v1466_v51 = vpack.c.bf16 %v724_v20, %v723_v29 }
  0xf9   : > { %1453 = vmatprep.subr.bf16.mxu1 %v1452_v23  ;;  %v627_v63 = vadd.f32 %v626_v3, %v625_v26  ;;  %v821_v14 = vsel %vm803_vm15, %v557_v6, %v820_v11  ;;  %vm1132_vm1 = vcmask 261120  }
  0xfa   : > { %v662_v8 = vadd.f32 %v661_v30, %v660_v13  ;;  %v822_v2 = vsel %vm805_vm2, %v592_v56, %v821_v14 }
  0xfb   : > { %v823_v21 = vsel %vm807_vm3, %v627_v63, %v822_v2 }
  0xfc   : > { %1455 = vmatpush3.bf16.msra.mxu1 %v1454_v38  ;;  %v824_v0 = vsel %vm809_vm4, %v662_v8, %v823_v21 }
  0xfd   : > { %1457 = vmatprep.subr.bf16.mxu1 %v1456_v12 }
 0x100   : > { %1459 = vmatpush3.bf16.msra.mxu1 %v1458_v35 }
 0x101   : > { %1461 = vmatprep.subr.bf16.mxu1 %v1460_v44 }
 0x104   : > { %1463 = vmatpush3.bf16.msra.mxu1 %v1462_v4 }
 0x105   : > { %1465 = vmatprep.subr.bf16.mxu1 %v1464_v33 }
 0x108   : > { %1467 = vmatpush3.bf16.msra.mxu1 %v1466_v51 }
 0x10b   : > { %979 = vmatmul.mubr.f32.vlgmr.msra.gmra.mrb[2].mxu1 %v824_v0 }
 0x1bb   : > { %v1304_v60 = vpop.f32.mrb[0].mxu1  ;;  %v1128_v50 = vpop.f32.mrb[0].mxu0 }
 0x1bc   : > { %v1305_v58 = vpop.f32.mrb[1].mxu1  ;;  %v1403_v7 = vpop.f32.mrb[1].mxu0 }
 0x1bd   : > { %v1306_v48 = vadd.f32 %v1305_v58, %v1304_v60 }
 0x1de   : > { %v1339_v46 = vpop.f32.mrb[2].mxu1 }
 0x1df   : > { %v1340_v49 = vpop.f32.mrb[3].mxu1 }
 0x1e0   : > { %v1341_v34 = vadd.f32 %v1340_v49, %v1339_v46 }
 0x1e2   : > { %v981_v54 = vadd.f32 %v1341_v34, %v1306_v48 }
 0x1e4   : > { %v1496_v42 = vadd.f32 %v1128_v50, %v981_v54 }
 0x1e6   : > { %1133 = vst.msk [vmem:[%s201_s13] sm:$0xff] %vm1132_vm1, %v1496_v42 }
 0x1e7   : > { %1555 = shalt.err (!%p1552_p3)
}
 0x1e8   : > { %s1556_s10 = scalar_lea.hbm %s2342_s5, 128  ;;  %s1560_s20 = scalar_lea.hbm %s2388_s4, 256 }
 0x1e9   : > { %p1557_p4 = scmp.ne.s32.totalorder %s2342_s5, %s1556_s10  ;;  %p1561_p9 = scmp.lt.u32.totalorder %s2342_s5, %s2388_s4 }
 0x1ea   : > { %p1562_p10 = scmp.lt.u32.totalorder %s1560_s20, %s1556_s10  ;;  %p1564_p12 = scmp.lt.u32.totalorder %s1556_s10, %s2342_s5 }
 0x1eb   : > { %p1558_p7 = pnand %p1557_p4, %p1674_p5 }
 0x1ec   : > { %p1563_p11 = por %p1562_p10, %p1561_p9 }
 0x1ed   : > { %p1559_p8 = pneg %p1558_p7 }
 0x1ee   : > { %p1565_p13 = por %p1564_p12, %p1563_p11 }
 0x1f0   : > { %p1566_p0 = pnand %p1565_p13, %p1559_p8 }
 0x1f2   : > { %1569 = shalt.err (!%p1566_p0)
}
 0x1f3   : > { %1499 = dma.vmem_to_hbm [thread:$0]  (%p1674_p5), %s2344_s14, 128, %s2342_s5, %s1135_s6  }
 0x1f4 PF: > { %p1505_p1 = scmp.ge.s32.totalorder %s1604_s18, 2  ;;  %s1160_s27 = sand.u32 1, %s1592_s15  }
 0x1f5   : > { %s1161_s28 = scalar_lea.sflag [#allocation3], %s1160_s27 }
 0x1f6   : > { %p1502_p2 = pnand %p1505_p1, %p1678_p6 }
 0x1f8   : > { %1587 = dma.done.wait (!%p1502_p2), %s1161_s28, 128  }
 0x1f9   : > { %1589 = vsyncadd (!%p1502_p2), %s1161_s28, 4294967168  ;;  %p14_p3 = scmp.ge.s32.totalorder %s1661_s21, 4   ;;  %s2427_s15 = smov %s1596_s16 }
 0x1fa   : > { %s2428_s16 = smov %s1600_s17  ;;  %s2429_s17 = smov %s1672_s24 }
 0x1fb   : > { %s2430_s18 = smov %s1661_s21  ;;  %16 = sbr.rel (!%p14_p3) target bundleno = 3 (0x3), region = 74 }
 0x202   :  { %1166 = vsyncpa [#allocation3], 1 }
 0x203   :  { %1168 = vsyncpa [#allocation3 + $0x1], 1 }

</bundles_post_ra>
